<compile_context>
chip_gen: v7x
topology: tpu7x:2x2x1
jax: 0.10.0
libtpu: 0.0.40
codegen_flags: <defaults>
</compile_context>

<pallas_src>
import jax
import jax.numpy as jnp
from jax.experimental import pallas as pl
from jax.experimental.pallas import tpu as pltpu

BN_EPS = 1e-5


def _mlp_head_kernel(x_ref, w1_ref, bn_ref, w2_ref, b2_ref, o_ref):
    """Grid = (out_dim tiles ["parallel"], hidden tiles ["arbitrary"]).

    x_ref  : (B, in_dim)   bf16, resident across the whole grid
    w1_ref : (in_dim, th)  bf16, hidden tile of W1
    bn_ref : (2, th)       f32, rows = [gamma; beta] for this hidden tile
    w2_ref : (th, tn)      bf16, (hidden, out) tile of W2
    b2_ref : (1, tn)       f32
    o_ref  : (B, tn)       f32 output block, resident across the hidden axis;
                           used directly as the accumulator (no scratch).
    """
    j = pl.program_id(1)  # hidden (reduction) axis

    @pl.when(j == 0)
    def _init():
        # Seed the resident output block with the Linear-2 bias; every hidden
        # step then accumulates its contribution straight into o_ref.
        o_ref[...] = jnp.broadcast_to(b2_ref[...], o_ref.shape).astype(o_ref.dtype)

    # ---- Linear 1 (bf16 MXU inputs, f32 accumulation).  The Linear-1 bias is
    # intentionally omitted: training-mode BatchNorm subtracts the per-feature
    # batch mean immediately after, so any per-feature shift cancels exactly.
    h = jnp.dot(x_ref[...], w1_ref[...], preferred_element_type=jnp.float32)

    # ---- BatchNorm1d (batch stats, biased variance) + ReLU, folded to one FMA.
    # Two-pass variance for numerical robustness vs. E[h^2] - mean^2.
    mean = jnp.mean(h, axis=0, keepdims=True)
    centered = h - mean
    var = jnp.mean(centered * centered, axis=0, keepdims=True)
    scale = bn_ref[0:1, :] * jax.lax.rsqrt(var + BN_EPS)     # gamma * rsqrt(var+eps)
    h = jnp.maximum(centered * scale + bn_ref[1:2, :], 0.0)  # BN + ReLU

    # ---- Linear 2: accumulate this hidden tile's contribution into o_ref.
    o_ref[...] += jnp.dot(h.astype(jnp.bfloat16), w2_ref[...],
                          preferred_element_type=jnp.float32)


def _vmem_capacity_bytes():
    try:
        return pltpu.get_tpu_info().vmem_capacity_bytes
    except Exception:
        return 64 << 20   # conservative (v7x-sized) fallback


def _tile_stream_bytes(th, tn, in_dim):
    # One set of streamed tiles: W1 (in_dim, th) bf16 + W2 (th, tn) bf16 +
    # bn (2 -> 8 padded sublanes, th) f32.
    return in_dim * th * 2 + th * tn * 2 + 8 * th * 4


def _plan(batch, in_dim, hidden, out_dim, vmem_cap):
    """Pick (hidden_tile, out_tile, weight_buffer_count) from a VMEM budget."""
    # Split out_dim across the "parallel" grid axis (feeds v7x's 2nd TensorCore)
    # only when each half still fills the 256-wide MXU and stays lane-aligned.
    tn = out_dim // 2 if (out_dim >= 512 and out_dim % 256 == 0) else out_dim

    budget = int((vmem_cap // 2) * 0.8)
    resident = (batch * in_dim * 2      # x, bf16, resident
                + batch * tn * 4        # resident f32 output block
                + 8 * tn * 4)           # b2 (padded to 8 sublanes)

    cands = sorted({t for t in (hidden, 2048, 1024, 512, 256, 128)
                    if t <= hidden and hidden % t == 0}, reverse=True)
    th = cands[-1]
    for t in cands:                     # biggest tile that fits, double-buffered
        if resident + 2 * _tile_stream_bytes(t, tn, in_dim) <= budget:
            th = t
            break

    nbuf = 2
    if (hidden // th >= 3 and vmem_cap >= (96 << 20)
            and resident + 3 * _tile_stream_bytes(th, tn, in_dim) <= budget):
        nbuf = 3        # 128-MiB-VMEM parts (v5e/v6e): deeper weight buffering
    return th, tn, nbuf


def mlp_head_forward(x, params, hidden_tile=None):
    """x: (B, in_dim).  params: dict with w1, gamma, beta, w2, b2 (+ unused b1)."""
    B, in_dim = x.shape
    hidden = params["w1"].shape[1]
    out_dim = params["w2"].shape[1]

    vmem_cap = _vmem_capacity_bytes()
    th, tn, nbuf = _plan(B, in_dim, hidden, out_dim, vmem_cap)
    if hidden_tile is not None:
        th, nbuf = hidden_tile, 2
    assert hidden % th == 0 and out_dim % tn == 0
    grid = (out_dim // tn, hidden // th)

    # Pre-cast activations and weights to bf16 once, in the wrapper: halves
    # HBM->VMEM traffic and removes the per-step in-kernel cast of x.
    x_bf16 = x.astype(jnp.bfloat16)
    w1 = params["w1"].astype(jnp.bfloat16)
    w2 = params["w2"].astype(jnp.bfloat16)
    # Pack gamma/beta into one (2, hidden) array -> one tiny DMA per tile.
    bn = jnp.concatenate([params["gamma"], params["beta"]], axis=0).astype(jnp.float32)
    b2 = params["b2"].astype(jnp.float32)

    def wspec(shape, index_map):
        if nbuf > 2:
            return pl.BlockSpec(shape, index_map, pipeline_mode=pl.Buffered(nbuf))
        return pl.BlockSpec(shape, index_map)

    return pl.pallas_call(
        _mlp_head_kernel,
        out_shape=jax.ShapeDtypeStruct((B, out_dim), jnp.float32),
        grid_spec=pltpu.PrefetchScalarGridSpec(
            num_scalar_prefetch=0,
            grid=grid,
            in_specs=[
                pl.BlockSpec((B, in_dim), lambda i, j: (0, 0)),   # x (resident)
                wspec((in_dim, th), lambda i, j: (0, j)),         # W1 hidden tile
                pl.BlockSpec((2, th), lambda i, j: (0, j)),       # [gamma; beta]
                wspec((th, tn), lambda i, j: (j, i)),             # W2 tile
                pl.BlockSpec((1, tn), lambda i, j: (0, i)),       # b2
            ],
            out_specs=pl.BlockSpec((B, tn), lambda i, j: (0, i)),
        ),
        compiler_params=pltpu.CompilerParams(
            # out_dim tiles are independent ("parallel" -> megacore); the
            # hidden axis is a reduction into the resident output block.
            dimension_semantics=("parallel", "arbitrary"),
            vmem_limit_bytes=vmem_cap // 2,
        ),
    )(x_bf16, w1, bn, w2, b2)


def init_params(key, in_dim, hidden_dim, out_dim):
    """Deterministic synthetic init (PyTorch-Linear-style uniform bounds)."""
    k1, k2, k3, k4 = jax.random.split(key, 4)
    bound1 = 1.0 / jnp.sqrt(in_dim)
    bound2 = 1.0 / jnp.sqrt(hidden_dim)
    return {
        # stored as (in_features, out_features) — transposed vs. torch
        "w1": jax.random.uniform(k1, (in_dim, hidden_dim), jnp.float32,
                                 -bound1, bound1),
        # b1 kept for module fidelity / reference only; the kernel does not
        # consume it (it cancels under training-mode BatchNorm).
        "b1": jax.random.uniform(k2, (1, hidden_dim), jnp.float32,
                                 -bound1, bound1),
        "gamma": jnp.ones((1, hidden_dim), jnp.float32),   # BN weight init
        "beta": jnp.zeros((1, hidden_dim), jnp.float32),   # BN bias init
        "w2": jax.random.uniform(k3, (hidden_dim, out_dim), jnp.float32,
                                 -bound2, bound2),
        "b2": jax.random.uniform(k4, (1, out_dim), jnp.float32,
                                 -bound2, bound2),
    }


def mlp_head_reference(x, p):
    """Pure-f32 reference with full PyTorch semantics (including b1)."""
    h = x @ p["w1"] + p["b1"]
    mean = jnp.mean(h, axis=0, keepdims=True)
    var = jnp.mean((h - mean) ** 2, axis=0, keepdims=True)
    h = (h - mean) / jnp.sqrt(var + BN_EPS) * p["gamma"] + p["beta"]
    h = jnp.maximum(h, 0.0)
    return h @ p["w2"] + p["b2"]


# TODO(synk): BatchNorm1d running_mean/running_var buffer updates (a training
# side effect, not part of the forward output) are not emitted by the kernel.

if __name__ == "__main__":
    # Small shapes consistent with the module defaults (hidden=512, out=256).
    B, IN_DIM, HIDDEN, OUT_DIM = 64, 128, 512, 256

    key = jax.random.PRNGKey(0)
    kx, kp = jax.random.split(key)
    x = jax.random.normal(kx, (B, IN_DIM), jnp.float32)
    params = init_params(kp, IN_DIM, HIDDEN, OUT_DIM)

    ref = mlp_head_reference(x, params)

    # Default plan: at this size the planner collapses to a single grid step
    # (no hidden tiling, no accumulate overhead) — the fast path.
    out = jax.block_until_ready(mlp_head_forward(x, params))
    assert out.shape == (B, OUT_DIM)
    # bf16 MXU inputs -> relaxed tolerance vs. the pure-f32 reference.
    assert jnp.allclose(out, ref, atol=5e-2, rtol=5e-2), (
        float(jnp.max(jnp.abs(out - ref))))

    # Path-coverage check only: force 2 hidden steps (tile=256, MXU-friendly)
    # to exercise the init/accumulate path of the reduction axis.
    out_tiled = jax.block_until_ready(mlp_head_forward(x, params, hidden_tile=256))
    assert jnp.allclose(out_tiled, ref, atol=5e-2, rtol=5e-2), (
        float(jnp.max(jnp.abs(out_tiled - ref))))

    print("KERNEL_OK")
</pallas_src>

<mosaic_0001>
module attributes {stable_mosaic.version = 11 : i64} {
  func.func @_mlp_head_kernel(%arg0: i32, %arg1: i32, %arg2: memref<64x128xbf16, #tpu.memory_space<vmem>>, %arg3: memref<128x512xbf16, #tpu.memory_space<vmem>>, %arg4: memref<2x512xf32, #tpu.memory_space<vmem>>, %arg5: memref<512x256xbf16, #tpu.memory_space<vmem>>, %arg6: memref<1x256xf32, #tpu.memory_space<vmem>>, %arg7: memref<64x256xf32, #tpu.memory_space<vmem>>) attributes {dimension_semantics = [#tpu.dimension_semantics<parallel>, #tpu.dimension_semantics<arbitrary>], iteration_bounds = array<i64: 1, 1>, scalar_prefetch = 0 : i64, scratch_operands = 0 : i64, tpu.core_type = #tpu.core_type<tc>, window_params = [{pipeline_mode = #tpu.pipeline_mode<synchronous>, transform_indices = @transform_0, window_bounds = array<i64: 64, 128>}, {transform_indices = @transform_1, window_bounds = array<i64: 128, 512>}, {transform_indices = @transform_2, window_bounds = array<i64: 2, 512>}, {transform_indices = @transform_3, window_bounds = array<i64: 512, 256>}, {transform_indices = @transform_4, window_bounds = array<i64: 1, 256>}, {transform_indices = @transform_5, window_bounds = array<i64: 64, 256>}]} {
    %c0_i32 = arith.constant 0 : i32
    %0 = arith.cmpi eq, %arg1, %c0_i32 : i32
    %1 = arith.extui %0 : i1 to i32
    %c0_i32_0 = arith.constant 0 : i32
    %2 = arith.cmpi ne, %1, %c0_i32_0 : i32
    scf.if %2 {
      %c0_20 = arith.constant 0 : index
      %c0_21 = arith.constant 0 : index
      %35 = vector.load %arg6[%c0_20, %c0_21] : memref<1x256xf32, #tpu.memory_space<vmem>>, vector<1x256xf32>
      %36 = vector.shape_cast %35 : vector<1x256xf32> to vector<1x256xf32>
      %37 = vector.broadcast %36 : vector<1x256xf32> to vector<64x256xf32>
      %c0_22 = arith.constant 0 : index
      %c0_23 = arith.constant 0 : index
      %38 = vector.load %arg7[%c0_22, %c0_23] : memref<64x256xf32, #tpu.memory_space<vmem>>, vector<64x256xf32>
      tpu.vector_store %arg7[%c0_22, %c0_23], %37 {strides = array<i32>} : memref<64x256xf32, #tpu.memory_space<vmem>>, vector<64x256xf32>,
    } else {
    }
    %c0 = arith.constant 0 : index
    %c0_1 = arith.constant 0 : index
    %3 = vector.load %arg2[%c0, %c0_1] : memref<64x128xbf16, #tpu.memory_space<vmem>>, vector<64x128xbf16>
    %c0_2 = arith.constant 0 : index
    %c0_3 = arith.constant 0 : index
    %4 = vector.load %arg3[%c0_2, %c0_3] : memref<128x512xbf16, #tpu.memory_space<vmem>>, vector<128x512xbf16>
    %cst = arith.constant dense<0.000000e+00> : vector<64x512xf32>
    %5 = tpu.matmul %3, %4, %cst {dimension_numbers = #tpu.dot_dimension_numbers<[1], [0], [0], [1], [0, 0, 1, 1], [], []>} : vector<64x128xbf16>, vector<128x512xbf16>, vector<64x512xf32> -> vector<64x512xf32>
    %cst_4 = arith.constant dense<0.000000e+00> : vector<512xf32>
    %6 = vector.multi_reduction <add>, %5, %cst_4 [0] : vector<64x512xf32> to vector<512xf32>
    %7 = vector.shape_cast %6 : vector<512xf32> to vector<1x512xf32>
    %cst_5 = arith.constant 6.400000e+01 : f32
    %8 = vector.broadcast %cst_5 : f32 to vector<1x512xf32>
    %9 = arith.divf %7, %8 : vector<1x512xf32>
    %10 = vector.broadcast %9 : vector<1x512xf32> to vector<64x512xf32>
    %11 = arith.subf %5, %10 : vector<64x512xf32>
    %12 = arith.mulf %11, %11 : vector<64x512xf32>
    %cst_6 = arith.constant dense<0.000000e+00> : vector<512xf32>
    %13 = vector.multi_reduction <add>, %12, %cst_6 [0] : vector<64x512xf32> to vector<512xf32>
    %14 = vector.shape_cast %13 : vector<512xf32> to vector<1x512xf32>
    %cst_7 = arith.constant 6.400000e+01 : f32
    %15 = vector.broadcast %cst_7 : f32 to vector<1x512xf32>
    %16 = arith.divf %14, %15 : vector<1x512xf32>
    %c0_8 = arith.constant 0 : index
    %c0_9 = arith.constant 0 : index
    %17 = vector.load %arg4[%c0_8, %c0_9] : memref<2x512xf32, #tpu.memory_space<vmem>>, vector<1x512xf32>
    %cst_10 = arith.constant 9.99999974E-6 : f32
    %18 = vector.broadcast %cst_10 : f32 to vector<1x512xf32>
    %19 = arith.addf %16, %18 : vector<1x512xf32>
    %20 = math.rsqrt %19 : vector<1x512xf32>
    %21 = arith.mulf %17, %20 : vector<1x512xf32>
    %22 = vector.broadcast %21 : vector<1x512xf32> to vector<64x512xf32>
    %23 = arith.mulf %11, %22 : vector<64x512xf32>
    %c1 = arith.constant 1 : index
    %c0_11 = arith.constant 0 : index
    %24 = vector.load %arg4[%c1, %c0_11] : memref<2x512xf32, #tpu.memory_space<vmem>>, vector<1x512xf32>
    %25 = vector.broadcast %24 : vector<1x512xf32> to vector<64x512xf32>
    %26 = arith.addf %23, %25 : vector<64x512xf32>
    %cst_12 = arith.constant 0.000000e+00 : f32
    %27 = vector.broadcast %cst_12 : f32 to vector<64x512xf32>
    %28 = arith.maximumf %26, %27 : vector<64x512xf32>
    %c0_13 = arith.constant 0 : index
    %c0_14 = arith.constant 0 : index
    %29 = vector.load %arg7[%c0_13, %c0_14] : memref<64x256xf32, #tpu.memory_space<vmem>>, vector<64x256xf32>
    %30 = arith.truncf %28 : vector<64x512xf32> to vector<64x512xbf16>
    %c0_15 = arith.constant 0 : index
    %c0_16 = arith.constant 0 : index
    %31 = vector.load %arg5[%c0_15, %c0_16] : memref<512x256xbf16, #tpu.memory_space<vmem>>, vector<512x256xbf16>
    %cst_17 = arith.constant dense<0.000000e+00> : vector<64x256xf32>
    %32 = tpu.matmul %30, %31, %cst_17 {dimension_numbers = #tpu.dot_dimension_numbers<[1], [0], [0], [1], [0, 0, 1, 1], [], []>} : vector<64x512xbf16>, vector<512x256xbf16>, vector<64x256xf32> -> vector<64x256xf32>
    %33 = arith.addf %29, %32 : vector<64x256xf32>
    %c0_18 = arith.constant 0 : index
    %c0_19 = arith.constant 0 : index
    %34 = vector.load %arg7[%c0_18, %c0_19] : memref<64x256xf32, #tpu.memory_space<vmem>>, vector<64x256xf32>
    tpu.vector_store %arg7[%c0_18, %c0_19], %33 {strides = array<i32>} : memref<64x256xf32, #tpu.memory_space<vmem>>, vector<64x256xf32>,
    return
  }
  func.func @transform_0(%arg0: i32, %arg1: i32) -> (i32, i32) {
    %c0_i32 = arith.constant 0 : i32
    %c0_i32_0 = arith.constant 0 : i32
    %c0_i32_1 = arith.constant 0 : i32
    return %c0_i32, %c0_i32_0 : i32, i32
  }
  func.func @transform_1(%arg0: i32, %arg1: i32) -> (i32, i32) {
    %c0_i32 = arith.constant 0 : i32
    %c0_i32_0 = arith.constant 0 : i32
    return %c0_i32, %arg1 : i32, i32
  }
  func.func @transform_2(%arg0: i32, %arg1: i32) -> (i32, i32) {
    %c0_i32 = arith.constant 0 : i32
    %c0_i32_0 = arith.constant 0 : i32
    return %c0_i32, %arg1 : i32, i32
  }
  func.func @transform_3(%arg0: i32, %arg1: i32) -> (i32, i32) {
    %c0_i32 = arith.constant 0 : i32
    return %arg1, %arg0 : i32, i32
  }
  func.func @transform_4(%arg0: i32, %arg1: i32) -> (i32, i32) {
    %c0_i32 = arith.constant 0 : i32
    %c0_i32_0 = arith.constant 0 : i32
    return %c0_i32, %arg0 : i32, i32
  }
  func.func @transform_5(%arg0: i32, %arg1: i32) -> (i32, i32) {
    %c0_i32 = arith.constant 0 : i32
    %c0_i32_0 = arith.constant 0 : i32
    return %c0_i32, %arg0 : i32, i32
  }
}

</mosaic_0001>

<bundles_post_ra>
// kernel: tpu_custom_call.1
= control target key start
LH: loop header
LB: loop body
LE: loop exit
PB: predicated region body
PF: predicated region fallthrough
CT: control target
= control target key end

     0   :  { %10 = vsyncpa [#allocation3], 0  ;;  %s2355_s0 = inlined_call_operand.hbm [shape: bf16[64,128], index: 0, kind: input, shape index: {}]   ;;  %s2356_s1 = inlined_call_operand.hbm [shape: bf16[128,512], index: 1, kind: input, shape index: {}]   ;;  %s2357_s2 = inlined_call_operand.hbm [shape: f32[2,512], index: 2, kind: input, shape index: {}]   ;;  %s2358_s3 = inlined_call_operand.hbm [shape: bf16[512,256], index: 3, kind: input, shape index: {}]   ;;  %s2359_s4 = inlined_call_operand.vmem [shape: f32[1,256], index: 4, kind: input, shape index: {}]   ;;  %s2360_s5 = inlined_call_operand.hbm [shape: f32[64,256], index: 5, kind: output, shape index: {}]  }
   0x1   :  { %11 = vsyncpa [#allocation6], 0 }
   0x2   :  { %12 = vsyncpa [#allocation9], 0 }
   0x3   :  { %13 = vsyncpa [#allocation4], 0  ;;  %s1849_s18 = smov [#allocation5]   ;;  %s1731_s22 = scalar_lea.hbm %s2356_s1, 4096 }
   0x4   :  { %s31_s19 = sshll.u32 %s1849_s18, 4  ;;  %p1732_p0 = scmp.ne.s32.totalorder %s2356_s1, %s1731_s22  ;;  %s32_s19 = int_to_ptr.vmem [resolvable:$true] %s31_s19 }
   0x5   :  { %p1735_p1 = scmp.lt.u32.totalorder %s1731_s22, %s2356_s1 }
   0x7   :  { %p1737_p2 = pnand %p1735_p1, %p1732_p0 }
   0x9   :  { %1740 = shalt.err (!%p1737_p2)
}
   0xa   :  { %s1741_s27 = scalar_lea.vmem %s32_s19, 4096  ;;  %p1746_p4 = scmp.lt.s32.totalorder %s32_s19, %s32_s19 }
   0xb   :  { %p1742_p3 = scmp.ne.s32.totalorder %s32_s19, %s1741_s27  ;;  %p1747_p5 = scmp.lt.s32.totalorder %s1741_s27, %s1741_s27 }
   0xd   :  { %p1748_p6 = por %p1747_p5, %p1746_p4 }
   0xf   :  { %p1749_p7 = pnand %p1748_p6, %p1742_p3 }
  0x11   :  { %1752 = shalt.err (!%p1749_p7)
}
  0x12   :  { %s1850_s28 = smov 256   ;;  %s1851_s29 = smov 16  }
  0x13   :  { %37 = dma.hbm_to_vmem [thread:$0]  %s2356_s1, 4096, %s32_s19, [#allocation6], %s1850_s28, %s1850_s28, %s1851_s29  }
  0x14   :  { %s1852_s7 = smov [#allocation2]   ;;  %s1753_s11 = scalar_lea.hbm %s2355_s0, 512 }
  0x15   :  { %s19_s8 = sshll.u32 %s1852_s7, 4  ;;  %p1754_p8 = scmp.ne.s32.totalorder %s2355_s0, %s1753_s11  ;;  %s20_s8 = int_to_ptr.vmem [resolvable:$true] %s19_s8 }
  0x16   :  { %p1757_p9 = scmp.lt.u32.totalorder %s1753_s11, %s2355_s0 }
  0x18   :  { %p1759_p10 = pnand %p1757_p9, %p1754_p8 }
  0x1a   :  { %1762 = shalt.err (!%p1759_p10)
}
  0x1b   :  { %s1763_s16 = scalar_lea.vmem %s20_s8, 512  ;;  %p1768_p12 = scmp.lt.s32.totalorder %s20_s8, %s20_s8 }
  0x1c   :  { %p1764_p11 = scmp.ne.s32.totalorder %s20_s8, %s1763_s16  ;;  %p1769_p13 = scmp.lt.s32.totalorder %s1763_s16, %s1763_s16 }
  0x1e   :  { %p1770_p0 = por %p1769_p13, %p1768_p12 }
  0x20   :  { %p1771_p1 = pnand %p1770_p0, %p1764_p11 }
  0x22   :  { %1774 = shalt.err (!%p1771_p1)
}
  0x23   :  { %s1853_s1 = smov 64   ;;  %s1854_s17 = smov 4  }
  0x24   :  { %25 = dma.hbm_to_vmem [thread:$0]  %s2355_s0, 512, %s20_s8, [#allocation3], %s1853_s1, %s1853_s1, %s1854_s17  }
  0x25   :  { %s1855_s20 = smov [#allocation7]   ;;  %s1856_s22 = smov [#allocation8]  }
  0x26   :  { %s44_s21 = sshll.u32 %s1855_s20, 4  ;;  %s53_s23 = sshll.u32 %s1856_s22, 4  ;;  %s45_s21 = int_to_ptr.vmem [resolvable:$true] %s44_s21  ;;  %s1919_s23 = int_to_ptr.vmem [resolvable:$true] %s53_s23 }
  0x27   :  { %s1775_s26 = scalar_lea.hbm %s2357_s2, 128 }
  0x28   :  { %p1776_p2 = scmp.ne.s32.totalorder %s2357_s2, %s1775_s26  ;;  %p1779_p3 = scmp.lt.u32.totalorder %s1775_s26, %s2357_s2 }
  0x2a   :  { %p1781_p4 = pnand %p1779_p3, %p1776_p2 }
  0x2c   :  { %1784 = shalt.err (!%p1781_p4)
}
  0x2d   :  { %s1785_s0 = scalar_lea.vmem %s45_s21, 128  ;;  %p1790_p6 = scmp.lt.s32.totalorder %s45_s21, %s45_s21 }
  0x2e   :  { %p1786_p5 = scmp.ne.s32.totalorder %s45_s21, %s1785_s0  ;;  %p1791_p7 = scmp.lt.s32.totalorder %s1785_s0, %s1785_s0 }
  0x30   :  { %p1792_p8 = por %p1791_p7, %p1790_p6 }
  0x32   :  { %p1793_p9 = pnand %p1792_p8, %p1786_p5 }
  0x34   :  { %1796 = shalt.err (!%p1793_p9)
}
  0x35   :  { %47 = dma.hbm_to_vmem [thread:$0]  %s2357_s2, 128, %s45_s21, [#allocation6]  }
  0x36   :  { %s1797_s12 = scalar_lea.hbm %s2358_s3, 8192 }
  0x37   :  { %p1798_p10 = scmp.ne.s32.totalorder %s2358_s3, %s1797_s12  ;;  %p1801_p11 = scmp.lt.u32.totalorder %s1797_s12, %s2358_s3 }
  0x39   :  { %p1803_p12 = pnand %p1801_p11, %p1798_p10 }
  0x3b   :  { %1806 = shalt.err (!%p1803_p12)
}
  0x3c   :  { %s1807_s1 = scalar_lea.vmem %s1919_s23, 8192  ;;  %p1812_p0 = scmp.lt.s32.totalorder %s1919_s23, %s1919_s23 }
  0x3d   :  { %p1808_p13 = scmp.ne.s32.totalorder %s1919_s23, %s1807_s1  ;;  %p1813_p1 = scmp.lt.s32.totalorder %s1807_s1, %s1807_s1 }
  0x3f   :  { %p1814_p2 = por %p1813_p1, %p1812_p0 }
  0x41   :  { %p1815_p3 = pnand %p1814_p2, %p1808_p13 }
  0x43   :  { %1818 = shalt.err (!%p1815_p3)
}
  0x44   :  { %s1857_s2 = smov 128   ;;  %s1858_s17 = smov 8  }
  0x45   :  { %59 = dma.hbm_to_vmem [thread:$0]  %s2358_s3, 8192, %s1919_s23, [#allocation9], %s1857_s2, %s1857_s2, %s1858_s17  }
  0x46   :  { %1841 = dma.done.wait [#allocation3], 512  }
  0x47   :  { %1842 = vsyncadd [#allocation3], 4294966784 }
  0x48   :  { %1843 = dma.done.wait [#allocation6], 4224  }
  0x49   :  { %1844 = vsyncadd [#allocation6], 4294963072 }
  0x4a   :  { %1845 = dma.done.wait [#allocation9], 8192  }
  0x4b   :  { %1846 = vsyncadd [#allocation9], 4294959104  ;;  %v1859_v0 = vmov 0   ;;  %v1575_v1 = vld [vmem:[#allocation5 + $0x4] ss:$16 sps:$4 sm:$0xff]   ;;  %v1624_v34 = vld [vmem:[#allocation2 + $0x8] sm:$0xff]  }
  0x4c   :  { %363 = vmatprep.mubr.bf16.mxu0 %v1859_v0  ;;  %436 = vmatprep.mubr.bf16.mxu1 %v1859_v0  ;;  %v1577_v2 = vld [vmem:[#allocation5 + $0xc] ss:$16 sps:$4 sm:$0xff]   ;;  %v1579_v3 = vld [vmem:[#allocation5] ss:$16 sps:$4 sm:$0xff]   ;;  %v1580_v4 = vld [vmem:[#allocation5 + $0x8] ss:$16 sps:$4 sm:$0xff]  }
  0x4d   :  { %331 = vmatprep.subr.bf16.mxu0 %v1575_v1  ;;  %404 = vmatprep.subr.bf16.mxu1 %v1577_v2  ;;  %v1581_v5 = vld [vmem:[#allocation5 + $0x24] ss:$16 sps:$4 sm:$0xff]   ;;  %v1583_v6 = vld [vmem:[#allocation5 + $0x2c] ss:$16 sps:$4 sm:$0xff]   ;;  %v1585_v7 = vld [vmem:[#allocation5 + $0x20] ss:$16 sps:$4 sm:$0xff]  }
  0x4e   :  { %332 = vmatpush1.bf16.msra.mxu0 %v1579_v3  ;;  %405 = vmatpush1.bf16.msra.mxu1 %v1580_v4  ;;  %v1586_v8 = vld [vmem:[#allocation5 + $0x28] ss:$16 sps:$4 sm:$0xff]   ;;  %v1587_v9 = vld [vmem:[#allocation5 + $0x44] ss:$16 sps:$4 sm:$0xff]   ;;  %v1589_v10 = vld [vmem:[#allocation5 + $0x4c] ss:$16 sps:$4 sm:$0xff]  }
  0x4f   :  { %333 = vmatprep.subr.bf16.mxu0 %v1581_v5  ;;  %406 = vmatprep.subr.bf16.mxu1 %v1583_v6  ;;  %v1591_v11 = vld [vmem:[#allocation5 + $0x40] ss:$16 sps:$4 sm:$0xff]   ;;  %v1592_v12 = vld [vmem:[#allocation5 + $0x48] ss:$16 sps:$4 sm:$0xff]   ;;  %v1593_v13 = vld [vmem:[#allocation5 + $0x64] ss:$16 sps:$4 sm:$0xff]  }
  0x50   :  { %v1595_v14 = vld [vmem:[#allocation5 + $0x6c] ss:$16 sps:$4 sm:$0xff]   ;;  %v1597_v15 = vld [vmem:[#allocation5 + $0x60] ss:$16 sps:$4 sm:$0xff]   ;;  %v1598_v16 = vld [vmem:[#allocation5 + $0x68] ss:$16 sps:$4 sm:$0xff]  }
  0x51   :  { %v1599_v17 = vld [vmem:[#allocation5 + $0x84] ss:$16 sps:$4 sm:$0xff]   ;;  %v1601_v18 = vld [vmem:[#allocation5 + $0x8c] ss:$16 sps:$4 sm:$0xff]   ;;  %v1603_v19 = vld [vmem:[#allocation5 + $0x80] ss:$16 sps:$4 sm:$0xff]  }
  0x52   :  { %334 = vmatpush1.bf16.msra.mxu0 %v1585_v7  ;;  %407 = vmatpush1.bf16.msra.mxu1 %v1586_v8  ;;  %v1604_v20 = vld [vmem:[#allocation5 + $0x88] ss:$16 sps:$4 sm:$0xff]   ;;  %v1605_v21 = vld [vmem:[#allocation5 + $0xa4] ss:$16 sps:$4 sm:$0xff]   ;;  %v1607_v22 = vld [vmem:[#allocation5 + $0xac] ss:$16 sps:$4 sm:$0xff]  }
  0x53   :  { %335 = vmatprep.subr.bf16.mxu0 %v1587_v9  ;;  %408 = vmatprep.subr.bf16.mxu1 %v1589_v10  ;;  %v1609_v23 = vld [vmem:[#allocation5 + $0xa0] ss:$16 sps:$4 sm:$0xff]   ;;  %v1610_v24 = vld [vmem:[#allocation5 + $0xa8] ss:$16 sps:$4 sm:$0xff]   ;;  %v1611_v25 = vld [vmem:[#allocation5 + $0xc4] ss:$16 sps:$4 sm:$0xff]  }
  0x54   :  { %v1613_v26 = vld [vmem:[#allocation5 + $0xcc] ss:$16 sps:$4 sm:$0xff]   ;;  %v1615_v27 = vld [vmem:[#allocation5 + $0xc0] ss:$16 sps:$4 sm:$0xff]   ;;  %v1616_v28 = vld [vmem:[#allocation5 + $0xc8] ss:$16 sps:$4 sm:$0xff]  }
  0x55   :  { %v1617_v29 = vld [vmem:[#allocation5 + $0xe4] ss:$16 sps:$4 sm:$0xff]   ;;  %v1619_v30 = vld [vmem:[#allocation5 + $0xec] ss:$16 sps:$4 sm:$0xff]   ;;  %v1621_v31 = vld [vmem:[#allocation5 + $0xe0] ss:$16 sps:$4 sm:$0xff]  }
  0x56   :  { %336 = vmatpush1.bf16.msra.mxu0 %v1591_v11  ;;  %409 = vmatpush1.bf16.msra.mxu1 %v1592_v12  ;;  %v1622_v32 = vld [vmem:[#allocation5 + $0xe8] ss:$16 sps:$4 sm:$0xff]   ;;  %v1623_v33 = vld [vmem:[#allocation2] sm:$0xff]   ;;  %v1625_v35 = vld [vmem:[#allocation2 + $0x10] sm:$0xff]  }
  0x57   :  { %337 = vmatprep.subr.bf16.mxu0 %v1593_v13  ;;  %410 = vmatprep.subr.bf16.mxu1 %v1595_v14  ;;  %v1626_v36 = vld [vmem:[#allocation2 + $0x18] sm:$0xff]   ;;  %v1629_v37 = vld [vmem:[#allocation8 + $0x4] ss:$8 sps:$4 sm:$0xff]   ;;  %v1627_v39 = vld [vmem:[#allocation8] ss:$8 sps:$4 sm:$0xff]  }
  0x58   :  { %v1632_v38 = vld [vmem:[#allocation8 + $0x104] ss:$8 sps:$4 sm:$0xff]   ;;  %v1630_v40 = vld [vmem:[#allocation8 + $0x100] ss:$8 sps:$4 sm:$0xff]   ;;  %v1635_v41 = vld [vmem:[#allocation8 + $0x14] ss:$8 sps:$4 sm:$0xff]  }
  0x59   :  { %v1638_v42 = vld [vmem:[#allocation8 + $0x114] ss:$8 sps:$4 sm:$0xff]   ;;  %v1633_v43 = vld [vmem:[#allocation8 + $0x10] ss:$8 sps:$4 sm:$0xff]   ;;  %v1641_v45 = vld [vmem:[#allocation8 + $0x24] ss:$8 sps:$4 sm:$0xff]  }
  0x5a   :  { %338 = vmatpush1.bf16.msra.mxu0 %v1597_v15  ;;  %411 = vmatpush1.bf16.msra.mxu1 %v1598_v16  ;;  %v1636_v44 = vld [vmem:[#allocation8 + $0x110] ss:$8 sps:$4 sm:$0xff]   ;;  %v1644_v46 = vld [vmem:[#allocation8 + $0x124] ss:$8 sps:$4 sm:$0xff]   ;;  %v1639_v47 = vld [vmem:[#allocation8 + $0x20] ss:$8 sps:$4 sm:$0xff]  }
  0x5b   :  { %339 = vmatprep.subr.bf16.mxu0 %v1599_v17  ;;  %412 = vmatprep.subr.bf16.mxu1 %v1601_v18  ;;  %v1642_v48 = vld [vmem:[#allocation8 + $0x120] ss:$8 sps:$4 sm:$0xff]   ;;  %v1647_v49 = vld [vmem:[#allocation8 + $0x34] ss:$8 sps:$4 sm:$0xff]   ;;  %v1645_v51 = vld [vmem:[#allocation8 + $0x30] ss:$8 sps:$4 sm:$0xff]  }
  0x5c   :  { %v1650_v50 = vld [vmem:[#allocation8 + $0x134] ss:$8 sps:$4 sm:$0xff]   ;;  %v1648_v52 = vld [vmem:[#allocation8 + $0x130] ss:$8 sps:$4 sm:$0xff]   ;;  %v1653_v53 = vld [vmem:[#allocation8 + $0x44] ss:$8 sps:$4 sm:$0xff]  }
  0x5d   :  { %v1656_v54 = vld [vmem:[#allocation8 + $0x144] ss:$8 sps:$4 sm:$0xff]   ;;  %v1651_v55 = vld [vmem:[#allocation8 + $0x40] ss:$8 sps:$4 sm:$0xff]   ;;  %v1659_v57 = vld [vmem:[#allocation8 + $0x54] ss:$8 sps:$4 sm:$0xff]  }
  0x5e   :  { %340 = vmatpush1.bf16.msra.mxu0 %v1603_v19  ;;  %413 = vmatpush1.bf16.msra.mxu1 %v1604_v20  ;;  %v1654_v56 = vld [vmem:[#allocation8 + $0x140] ss:$8 sps:$4 sm:$0xff]   ;;  %v1662_v58 = vld [vmem:[#allocation8 + $0x154] ss:$8 sps:$4 sm:$0xff]   ;;  %v1657_v59 = vld [vmem:[#allocation8 + $0x50] ss:$8 sps:$4 sm:$0xff]  }
  0x5f   :  { %341 = vmatprep.subr.bf16.mxu0 %v1605_v21  ;;  %414 = vmatprep.subr.bf16.mxu1 %v1607_v22  ;;  %v1660_v60 = vld [vmem:[#allocation8 + $0x150] ss:$8 sps:$4 sm:$0xff]   ;;  %v1665_v61 = vld [vmem:[#allocation8 + $0x64] ss:$8 sps:$4 sm:$0xff]   ;;  %v1663_v63 = vld [vmem:[#allocation8 + $0x60] ss:$8 sps:$4 sm:$0xff]  }
  0x60   :  { %v1668_v62 = vld [vmem:[#allocation8 + $0x164] ss:$8 sps:$4 sm:$0xff]   ;;  %v1671_v1 = vld [vmem:[#allocation8 + $0x74] ss:$8 sps:$4 sm:$0xff]   ;;  %v1669_v3 = vld [vmem:[#allocation8 + $0x70] ss:$8 sps:$4 sm:$0xff]  }
  0x61   :  { %v1674_v2 = vld [vmem:[#allocation8 + $0x174] ss:$8 sps:$4 sm:$0xff]   ;;  %v1672_v4 = vld [vmem:[#allocation8 + $0x170] ss:$8 sps:$4 sm:$0xff]   ;;  %v1677_v5 = vld [vmem:[#allocation8 + $0x84] ss:$8 sps:$4 sm:$0xff]  }
  0x62   :  { %342 = vmatpush1.bf16.msra.mxu0 %v1609_v23  ;;  %415 = vmatpush1.bf16.msra.mxu1 %v1610_v24  ;;  %v1680_v6 = vld [vmem:[#allocation8 + $0x184] ss:$8 sps:$4 sm:$0xff]   ;;  %v1675_v7 = vld [vmem:[#allocation8 + $0x80] ss:$8 sps:$4 sm:$0xff]   ;;  %v1683_v9 = vld [vmem:[#allocation8 + $0x94] ss:$8 sps:$4 sm:$0xff]  }
  0x63   :  { %343 = vmatprep.subr.bf16.mxu0 %v1611_v25  ;;  %416 = vmatprep.subr.bf16.mxu1 %v1613_v26  ;;  %v1678_v8 = vld [vmem:[#allocation8 + $0x180] ss:$8 sps:$4 sm:$0xff]   ;;  %v1686_v10 = vld [vmem:[#allocation8 + $0x194] ss:$8 sps:$4 sm:$0xff]   ;;  %v1681_v11 = vld [vmem:[#allocation8 + $0x90] ss:$8 sps:$4 sm:$0xff]  }
  0x64   :  { %v1684_v12 = vld [vmem:[#allocation8 + $0x190] ss:$8 sps:$4 sm:$0xff]   ;;  %v1689_v13 = vld [vmem:[#allocation8 + $0xa4] ss:$8 sps:$4 sm:$0xff]   ;;  %v1687_v15 = vld [vmem:[#allocation8 + $0xa0] ss:$8 sps:$4 sm:$0xff]  }
  0x65   :  { %v1692_v14 = vld [vmem:[#allocation8 + $0x1a4] ss:$8 sps:$4 sm:$0xff]   ;;  %v1690_v16 = vld [vmem:[#allocation8 + $0x1a0] ss:$8 sps:$4 sm:$0xff]   ;;  %v1695_v17 = vld [vmem:[#allocation8 + $0xb4] ss:$8 sps:$4 sm:$0xff]  }
  0x66   :  { %344 = vmatpush1.bf16.msra.mxu0 %v1615_v27  ;;  %417 = vmatpush1.bf16.msra.mxu1 %v1616_v28  ;;  %v1698_v18 = vld [vmem:[#allocation8 + $0x1b4] ss:$8 sps:$4 sm:$0xff]   ;;  %v1693_v19 = vld [vmem:[#allocation8 + $0xb0] ss:$8 sps:$4 sm:$0xff]   ;;  %v1701_v21 = vld [vmem:[#allocation8 + $0xc4] ss:$8 sps:$4 sm:$0xff]  }
  0x67   :  { %345 = vmatprep.subr.bf16.mxu0 %v1617_v29  ;;  %418 = vmatprep.subr.bf16.mxu1 %v1619_v30  ;;  %v1696_v20 = vld [vmem:[#allocation8 + $0x1b0] ss:$8 sps:$4 sm:$0xff]   ;;  %v1704_v22 = vld [vmem:[#allocation8 + $0x1c4] ss:$8 sps:$4 sm:$0xff]   ;;  %v1699_v23 = vld [vmem:[#allocation8 + $0xc0] ss:$8 sps:$4 sm:$0xff]  }
  0x68   :  { %v1702_v24 = vld [vmem:[#allocation8 + $0x1c0] ss:$8 sps:$4 sm:$0xff]   ;;  %v1707_v25 = vld [vmem:[#allocation8 + $0xd4] ss:$8 sps:$4 sm:$0xff]   ;;  %v1705_v27 = vld [vmem:[#allocation8 + $0xd0] ss:$8 sps:$4 sm:$0xff]  }
  0x69   :  { %v1710_v26 = vld [vmem:[#allocation8 + $0x1d4] ss:$8 sps:$4 sm:$0xff]   ;;  %v1708_v28 = vld [vmem:[#allocation8 + $0x1d0] ss:$8 sps:$4 sm:$0xff]   ;;  %v1713_v29 = vld [vmem:[#allocation8 + $0xe4] ss:$8 sps:$4 sm:$0xff]  }
  0x6a   :  { %346 = vmatpush1.bf16.msra.mxu0 %v1621_v31  ;;  %419 = vmatpush1.bf16.msra.mxu1 %v1622_v32  ;;  %v1711_v30 = vld [vmem:[#allocation8 + $0xe0] ss:$8 sps:$4 sm:$0xff]   ;;  %v1716_v32 = vld [vmem:[#allocation8 + $0x1e4] ss:$8 sps:$4 sm:$0xff]  }
  0x6b   :  { %1249 = vmatprep.subr.bf16.mxu1 %v1629_v37  ;;  %1322 = vmatprep.subr.bf16.mxu0 %v1632_v38  ;;  %v1714_v31 = vld [vmem:[#allocation8 + $0x1e0] ss:$8 sps:$4 sm:$0xff]  }
  0x6d   :  { %364 = vmatmul.mubr.bf16.vlgmr.msra.gmra.mrb[0].mxu0 %v1623_v33  ;;  %437 = vmatmul.mubr.bf16.vlgmr.msra.gmra.mrb[0].mxu1 %v1623_v33  ;;  %v1719_v33 = vld [vmem:[#allocation8 + $0xf4] ss:$8 sps:$4 sm:$0xff]  }
  0x6e   :  { %373 = vmatprep.mubr.bf16.mxu0 %v1859_v0  ;;  %446 = vmatprep.mubr.bf16.mxu1 %v1859_v0 }
  0x6f   :  { %1250 = vmatpush1.bf16.msra.mxu1 %v1627_v39  ;;  %1323 = vmatpush1.bf16.msra.mxu0 %v1630_v40 }
  0x70   :  { %1251 = vmatprep.subr.bf16.mxu1 %v1635_v41  ;;  %1324 = vmatprep.subr.bf16.mxu0 %v1638_v42 }
  0x73   :  { %1252 = vmatpush1.bf16.msra.mxu1 %v1633_v43  ;;  %1325 = vmatpush1.bf16.msra.mxu0 %v1636_v44 }
  0x74   :  { %1253 = vmatprep.subr.bf16.mxu1 %v1641_v45  ;;  %1326 = vmatprep.subr.bf16.mxu0 %v1644_v46 }
  0x75   :  { %374 = vmatmul.mubr.bf16.gmra.mrb[4].mxu0 %v1624_v34  ;;  %447 = vmatmul.mubr.bf16.gmra.mrb[4].mxu1 %v1624_v34  ;;  %v1717_v34 = vld [vmem:[#allocation8 + $0xf0] ss:$8 sps:$4 sm:$0xff]  }
  0x76   :  { %383 = vmatprep.mubr.bf16.mxu0 %v1859_v0  ;;  %456 = vmatprep.mubr.bf16.mxu1 %v1859_v0 }
  0x77   :  { %1254 = vmatpush1.bf16.msra.mxu1 %v1639_v47  ;;  %1327 = vmatpush1.bf16.msra.mxu0 %v1642_v48 }
  0x78   :  { %1255 = vmatprep.subr.bf16.mxu1 %v1647_v49  ;;  %1328 = vmatprep.subr.bf16.mxu0 %v1650_v50 }
  0x7b   :  { %1256 = vmatpush1.bf16.msra.mxu1 %v1645_v51  ;;  %1329 = vmatpush1.bf16.msra.mxu0 %v1648_v52 }
  0x7c   :  { %1257 = vmatprep.subr.bf16.mxu1 %v1653_v53  ;;  %1330 = vmatprep.subr.bf16.mxu0 %v1656_v54 }
  0x7d   :  { %384 = vmatmul.mubr.bf16.gmra.mrb[8].mxu0 %v1625_v35  ;;  %457 = vmatmul.mubr.bf16.gmra.mrb[8].mxu1 %v1625_v35  ;;  %v1722_v35 = vld [vmem:[#allocation8 + $0x1f4] ss:$8 sps:$4 sm:$0xff]  }
  0x7e   :  { %393 = vmatprep.mubr.bf16.mxu0 %v1859_v0  ;;  %466 = vmatprep.mubr.bf16.mxu1 %v1859_v0  ;;  %v1666_v0 = vld [vmem:[#allocation8 + $0x160] ss:$8 sps:$4 sm:$0xff]  }
  0x7f   :  { %1258 = vmatpush1.bf16.msra.mxu1 %v1651_v55  ;;  %1331 = vmatpush1.bf16.msra.mxu0 %v1654_v56 }
  0x80   :  { %1259 = vmatprep.subr.bf16.mxu1 %v1659_v57  ;;  %1332 = vmatprep.subr.bf16.mxu0 %v1662_v58 }
  0x83   :  { %1260 = vmatpush1.bf16.msra.mxu1 %v1657_v59  ;;  %1333 = vmatpush1.bf16.msra.mxu0 %v1660_v60 }
  0x84   :  { %1261 = vmatprep.subr.bf16.mxu1 %v1665_v61  ;;  %1334 = vmatprep.subr.bf16.mxu0 %v1668_v62 }
  0x85   :  { %394 = vmatmul.mubr.bf16.gmra.mrb[12].mxu0 %v1626_v36  ;;  %467 = vmatmul.mubr.bf16.gmra.mrb[12].mxu1 %v1626_v36  ;;  %v1720_v36 = vld [vmem:[#allocation8 + $0x1f0] ss:$8 sps:$4 sm:$0xff]  }
  0x87   :  { %1262 = vmatpush1.bf16.msra.mxu1 %v1663_v63  ;;  %1335 = vmatpush1.bf16.msra.mxu0 %v1666_v0 }
  0x88   :  { %1263 = vmatprep.subr.bf16.mxu1 %v1671_v1  ;;  %1336 = vmatprep.subr.bf16.mxu0 %v1674_v2 }
  0x8b   :  { %1264 = vmatpush1.bf16.msra.mxu1 %v1669_v3  ;;  %1337 = vmatpush1.bf16.msra.mxu0 %v1672_v4 }
  0x8c   :  { %1265 = vmatprep.subr.bf16.mxu1 %v1677_v5  ;;  %1338 = vmatprep.subr.bf16.mxu0 %v1680_v6 }
  0x8f   :  { %1266 = vmatpush1.bf16.msra.mxu1 %v1675_v7  ;;  %1339 = vmatpush1.bf16.msra.mxu0 %v1678_v8 }
  0x90   :  { %1267 = vmatprep.subr.bf16.mxu1 %v1683_v9  ;;  %1340 = vmatprep.subr.bf16.mxu0 %v1686_v10 }
  0x93   :  { %1268 = vmatpush1.bf16.msra.mxu1 %v1681_v11  ;;  %1341 = vmatpush1.bf16.msra.mxu0 %v1684_v12 }
  0x94   :  { %1269 = vmatprep.subr.bf16.mxu1 %v1689_v13  ;;  %1342 = vmatprep.subr.bf16.mxu0 %v1692_v14 }
  0x97   :  { %1270 = vmatpush1.bf16.msra.mxu1 %v1687_v15  ;;  %1343 = vmatpush1.bf16.msra.mxu0 %v1690_v16 }
  0x98   :  { %1271 = vmatprep.subr.bf16.mxu1 %v1695_v17  ;;  %1344 = vmatprep.subr.bf16.mxu0 %v1698_v18 }
  0x9b   :  { %1272 = vmatpush1.bf16.msra.mxu1 %v1693_v19  ;;  %1345 = vmatpush1.bf16.msra.mxu0 %v1696_v20 }
  0x9c   :  { %1273 = vmatprep.subr.bf16.mxu1 %v1701_v21  ;;  %1346 = vmatprep.subr.bf16.mxu0 %v1704_v22 }
  0x9f   :  { %1274 = vmatpush1.bf16.msra.mxu1 %v1699_v23  ;;  %1347 = vmatpush1.bf16.msra.mxu0 %v1702_v24 }
  0xa0   :  { %1275 = vmatprep.subr.bf16.mxu1 %v1707_v25  ;;  %1348 = vmatprep.subr.bf16.mxu0 %v1710_v26 }
  0xa3   :  { %1276 = vmatpush1.bf16.msra.mxu1 %v1705_v27  ;;  %1349 = vmatpush1.bf16.msra.mxu0 %v1708_v28 }
  0xa4   :  { %1277 = vmatprep.subr.bf16.mxu1 %v1713_v29  ;;  %1350 = vmatprep.subr.bf16.mxu0 %v1716_v32 }
  0xa7   :  { %1278 = vmatpush1.bf16.msra.mxu1 %v1711_v30  ;;  %1351 = vmatpush1.bf16.msra.mxu0 %v1714_v31 }
  0xa8   :  { %1279 = vmatprep.subr.bf16.mxu1 %v1719_v33  ;;  %1352 = vmatprep.subr.bf16.mxu0 %v1722_v35 }
  0xab   :  { %1280 = vmatpush1.bf16.msra.mxu1 %v1717_v34  ;;  %1353 = vmatpush1.bf16.msra.mxu0 %v1720_v36 }
 0x140   :  { %v1958_v37 = vpop.f32.mrb[0].mxu0  ;;  %v1960_v38 = vpop.f32.mrb[0].mxu1 }
 0x141   :  { %v1962_v39 = vpop.f32.mrb[1].mxu0  ;;  %v1964_v40 = vpop.f32.mrb[1].mxu1 }
 0x142   :  { %v1966_v41 = vpop.f32.mrb[2].mxu0  ;;  %v1968_v42 = vpop.f32.mrb[2].mxu1 }
 0x143   :  { %v477_v43 = vadd.f32 %v1966_v41, %v1958_v37  ;;  %v503_v44 = vadd.f32 %v1968_v42, %v1960_v38  ;;  %v1974_v45 = vpop.f32.mrb[3].mxu0  ;;  %v1976_v46 = vpop.f32.mrb[3].mxu1 }
 0x144   :  { %v490_v47 = vadd.f32 %v1974_v45, %v1962_v39  ;;  %v516_v48 = vadd.f32 %v1976_v46, %v1964_v40 }
 0x148   :  { %v1982_v49 = vpop.f32.mrb[4].mxu0  ;;  %v1984_v50 = vpop.f32.mrb[4].mxu1 }
 0x149   :  { %v478_v51 = vadd.f32 %v477_v43, %v1982_v49  ;;  %v504_v52 = vadd.f32 %v503_v44, %v1984_v50  ;;  %v1988_v53 = vpop.f32.mrb[5].mxu0  ;;  %v1990_v54 = vpop.f32.mrb[5].mxu1 }
 0x14a   :  { %v491_v55 = vadd.f32 %v490_v47, %v1988_v53  ;;  %v517_v56 = vadd.f32 %v516_v48, %v1990_v54  ;;  %v1994_v57 = vpop.f32.mrb[6].mxu0  ;;  %v1996_v58 = vpop.f32.mrb[6].mxu1 }
 0x14b   :  { %v479_v59 = vadd.f32 %v478_v51, %v1994_v57  ;;  %v505_v60 = vadd.f32 %v504_v52, %v1996_v58  ;;  %v2000_v61 = vpop.f32.mrb[7].mxu0  ;;  %v2002_v62 = vpop.f32.mrb[7].mxu1 }
 0x14c   :  { %v492_v63 = vadd.f32 %v491_v55, %v2000_v61  ;;  %v518_v0 = vadd.f32 %v517_v56, %v2002_v62 }
 0x150   :  { %v385_v1 = vpop.f32.mrb[8].mxu0  ;;  %v2006_v2 = vpop.f32.mrb[8].mxu1 }
 0x151   :  { %v480_v3 = vadd.f32 %v479_v59, %v385_v1  ;;  %v506_v4 = vadd.f32 %v505_v60, %v2006_v2  ;;  %v2009_v5 = vpop.f32.mrb[9].mxu0  ;;  %v2011_v6 = vpop.f32.mrb[9].mxu1 }
 0x152   :  { %v493_v7 = vadd.f32 %v492_v63, %v2009_v5  ;;  %v519_v8 = vadd.f32 %v518_v0, %v2011_v6  ;;  %v389_v9 = vpop.f32.mrb[10].mxu0  ;;  %v2015_v10 = vpop.f32.mrb[10].mxu1 }
 0x153   :  { %v481_v11 = vadd.f32 %v480_v3, %v389_v9  ;;  %v507_v12 = vadd.f32 %v506_v4, %v2015_v10  ;;  %v2018_v13 = vpop.f32.mrb[11].mxu0  ;;  %v2020_v14 = vpop.f32.mrb[11].mxu1 }
 0x154   :  { %v494_v15 = vadd.f32 %v493_v7, %v2018_v13  ;;  %v520_v16 = vadd.f32 %v519_v8, %v2020_v14 }
 0x158   :  { %v395_v17 = vpop.f32.mrb[12].mxu0  ;;  %v468_v18 = vpop.f32.mrb[12].mxu1 }
 0x159   :  { %v482_v19 = vadd.f32 %v481_v11, %v395_v17  ;;  %v508_v20 = vadd.f32 %v507_v12, %v468_v18  ;;  %v2024_v21 = vpop.f32.mrb[13].mxu0  ;;  %v2026_v22 = vpop.f32.mrb[13].mxu1 }
 0x15a   :  { %v495_v23 = vadd.f32 %v494_v15, %v2024_v21  ;;  %v521_v24 = vadd.f32 %v520_v16, %v2026_v22  ;;  %v399_v25 = vpop.f32.mrb[14].mxu0  ;;  %v472_v26 = vpop.f32.mrb[14].mxu1 }
 0x15b   :  { %v483_v27 = vadd.f32 %v482_v19, %v399_v25  ;;  %v509_v28 = vadd.f32 %v508_v20, %v472_v26  ;;  %v2030_v29 = vpop.f32.mrb[15].mxu0  ;;  %v2032_v30 = vpop.f32.mrb[15].mxu1 }
 0x15c   :  { %v496_v31 = vadd.f32 %v495_v23, %v2030_v29  ;;  %v522_v32 = vadd.f32 %v521_v24, %v2032_v30 }
 0x15d   :  { %v484_v33 = vrot.slane %v483_v27, 4  ;;  %v510_v34 = vrot.slane %v509_v28, 4 }
 0x15e   :  { %v497_v35 = vrot.slane %v496_v31, 4  ;;  %v523_v36 = vrot.slane %v522_v32, 4 }
 0x15f   :  { %v485_v43 = vadd.f32 %v484_v33, %v483_v27  ;;  %v511_v44 = vadd.f32 %v510_v34, %v509_v28 }
 0x160   :  { %v498_v47 = vadd.f32 %v497_v35, %v496_v31  ;;  %v524_v48 = vadd.f32 %v523_v36, %v522_v32 }
 0x161   :  { %v486_v51 = vrot.slane %v485_v43, 2  ;;  %v512_v52 = vrot.slane %v511_v44, 2 }
 0x162   :  { %v499_v55 = vrot.slane %v498_v47, 2  ;;  %v525_v56 = vrot.slane %v524_v48, 2 }
 0x163   :  { %v487_v59 = vadd.f32 %v486_v51, %v485_v43  ;;  %v513_v60 = vadd.f32 %v512_v52, %v511_v44 }
 0x164   :  { %v500_v63 = vadd.f32 %v499_v55, %v498_v47  ;;  %v526_v0 = vadd.f32 %v525_v56, %v524_v48 }
 0x165   :  { %v488_v3 = vrot.slane %v487_v59, 1  ;;  %v514_v4 = vrot.slane %v513_v60, 1 }
 0x166   :  { %v501_v7 = vrot.slane %v500_v63, 1  ;;  %v527_v8 = vrot.slane %v526_v0, 1 }
 0x167   :  { %v489_v11 = vadd.f32 %v488_v3, %v487_v59  ;;  %v515_v12 = vadd.f32 %v514_v4, %v513_v60 }
 0x168   :  { %v502_v19 = vadd.f32 %v501_v7, %v500_v63  ;;  %v528_v20 = vadd.f32 %v527_v8, %v526_v0 }
 0x169   :  { %v530_v15 = vmul.f32 0.015625, %v489_v11  ;;  %v532_v16 = vmul.f32 0.015625, %v515_v12 }
 0x16a   :  { %v533_v35 = vmul.f32 0.015625, %v528_v20 }
 0x16b   :  { %v2037_v23 = vsub.f32 %v1958_v37, %v530_v15  ;;  %v2040_v24 = vsub.f32 %v1966_v41, %v530_v15  ;;  %v2043_v27 = vsub.f32 %v1982_v49, %v530_v15  ;;  %v2046_v28 = vsub.f32 %v1994_v57, %v530_v15 }
 0x16c   :  { %v2048_v31 = vsub.f32 %v385_v1, %v530_v15  ;;  %v2050_v32 = vsub.f32 %v389_v9, %v530_v15  ;;  %v2052_v33 = vsub.f32 %v395_v17, %v530_v15  ;;  %v2054_v34 = vsub.f32 %v399_v25, %v530_v15 }
 0x16d   :  { %v566_v37 = vmul.f32 %v2037_v23, %v2037_v23  ;;  %v570_v41 = vmul.f32 %v2040_v24, %v2040_v24  ;;  %v574_v49 = vmul.f32 %v2043_v27, %v2043_v27  ;;  %v578_v57 = vmul.f32 %v2046_v28, %v2046_v28 }
 0x16e   :  { %v531_v1 = vmul.f32 0.015625, %v502_v19  ;;  %v2065_v17 = vsub.f32 %v1960_v38, %v532_v16  ;;  %v2068_v25 = vsub.f32 %v1968_v42, %v532_v16  ;;  %v2071_v36 = vsub.f32 %v1984_v50, %v532_v16 }
 0x16f   :  { %v598_v9 = vadd.f32 %v570_v41, %v566_v37  ;;  %v2074_v43 = vsub.f32 %v1996_v58, %v532_v16  ;;  %v2077_v44 = vsub.f32 %v2006_v2, %v532_v16  ;;  %v2080_v47 = vsub.f32 %v2015_v10, %v532_v16 }
 0x170   :  { %v2082_v48 = vsub.f32 %v468_v18, %v532_v16  ;;  %v2084_v38 = vsub.f32 %v472_v26, %v532_v16  ;;  %v568_v42 = vmul.f32 %v2065_v17, %v2065_v17  ;;  %v572_v50 = vmul.f32 %v2068_v25, %v2068_v25 }
 0x171   :  { %v599_v51 = vadd.f32 %v598_v9, %v574_v49  ;;  %v582_v58 = vmul.f32 %v2048_v31, %v2048_v31  ;;  %v586_v2 = vmul.f32 %v2050_v32, %v2050_v32  ;;  %v590_v10 = vmul.f32 %v2052_v33, %v2052_v33 }
 0x172   :  { %v594_v18 = vmul.f32 %v2054_v34, %v2054_v34  ;;  %v576_v52 = vmul.f32 %v2071_v36, %v2071_v36  ;;  %v580_v55 = vmul.f32 %v2074_v43, %v2074_v43  ;;  %v624_v56 = vadd.f32 %v572_v50, %v568_v42 }
 0x173   :  { %v600_v26 = vadd.f32 %v599_v51, %v578_v57  ;;  %v2103_v59 = vsub.f32 %v1962_v39, %v531_v1  ;;  %v2106_v60 = vsub.f32 %v1974_v45, %v531_v1  ;;  %v2109_v63 = vsub.f32 %v1988_v53, %v531_v1 }
 0x174   :  { %v2112_v0 = vsub.f32 %v2000_v61, %v531_v1  ;;  %v625_v4 = vadd.f32 %v624_v56, %v576_v52  ;;  %v2115_v7 = vsub.f32 %v2009_v5, %v531_v1  ;;  %v2118_v8 = vsub.f32 %v2018_v13, %v531_v1 }
 0x175   :  { %v601_v3 = vadd.f32 %v600_v26, %v582_v58  ;;  %v2121_v39 = vsub.f32 %v2024_v21, %v531_v1  ;;  %v2124_v45 = vsub.f32 %v2030_v29, %v531_v1  ;;  %v567_v53 = vmul.f32 %v2103_v59, %v2103_v59 }
 0x176   :  { %v571_v61 = vmul.f32 %v2106_v60, %v2106_v60  ;;  %v584_v5 = vmul.f32 %v2077_v44, %v2077_v44  ;;  %v588_v13 = vmul.f32 %v2080_v47, %v2080_v47  ;;  %v626_v12 = vadd.f32 %v625_v4, %v580_v55 }
 0x177   :  { %v602_v11 = vadd.f32 %v601_v3, %v586_v2  ;;  %v592_v21 = vmul.f32 %v2082_v48, %v2082_v48  ;;  %v596_v29 = vmul.f32 %v2084_v38, %v2084_v38  ;;  %v575_v15 = vmul.f32 %v2109_v63, %v2109_v63 }
 0x178   :  { %v579_v16 = vmul.f32 %v2112_v0, %v2112_v0  ;;  %v627_v20 = vadd.f32 %v626_v12, %v584_v5  ;;  %v611_v37 = vadd.f32 %v571_v61, %v567_v53  ;;  %v2143_v41 = vsub.f32 %v1964_v40, %v533_v35 }
 0x179   :  { %v603_v19 = vadd.f32 %v602_v11, %v590_v10  ;;  %v2146_v49 = vsub.f32 %v1976_v46, %v533_v35  ;;  %v2149_v57 = vsub.f32 %v1990_v54, %v533_v35  ;;  %v2152_v1 = vsub.f32 %v2002_v62, %v533_v35 }
 0x17a   :  { %v2155_v9 = vsub.f32 %v2011_v6, %v533_v35  ;;  %v628_v42 = vadd.f32 %v627_v20, %v588_v13  ;;  %v612_v50 = vadd.f32 %v611_v37, %v575_v15  ;;  %v2158_v58 = vsub.f32 %v2020_v14, %v533_v35 }
 0x17b   :  { %v604_v51 = vadd.f32 %v603_v19, %v594_v18  ;;  %v2161_v40 = vsub.f32 %v2026_v22, %v533_v35  ;;  %v2164_v46 = vsub.f32 %v2032_v30, %v533_v35  ;;  %v569_v54 = vmul.f32 %v2143_v41, %v2143_v41 }
 0x17c   :  { %v573_v62 = vmul.f32 %v2146_v49, %v2146_v49  ;;  %v629_v2 = vadd.f32 %v628_v42, %v592_v21  ;;  %v583_v10 = vmul.f32 %v2115_v7, %v2115_v7  ;;  %v613_v18 = vadd.f32 %v612_v50, %v579_v16 }
 0x17d   :  { %v605_v6 = vrot.slane %v604_v51, 4  ;;  %v587_v22 = vmul.f32 %v2118_v8, %v2118_v8  ;;  %v577_v30 = vmul.f32 %v2149_v57, %v2149_v57  ;;  %v591_v3 = vmul.f32 %v2121_v39, %v2121_v39 }
 0x17e   :  { %v630_v26 = vadd.f32 %v629_v2, %v596_v29  ;;  %v614_v52 = vadd.f32 %v613_v18, %v583_v10  ;;  %v637_v35 = vadd.f32 %v573_v62, %v569_v54  ;;  %v581_v53 = vmul.f32 %v2152_v1, %v2152_v1 }
 0x17f   :  { %v606_v14 = vadd.f32 %v605_v6, %v604_v51  ;;  %v595_v13 = vmul.f32 %v2124_v45, %v2124_v45  ;;  %v585_v21 = vmul.f32 %v2155_v9, %v2155_v9  ;;  %v589_v20 = vmul.f32 %v2158_v58, %v2158_v58 }
 0x180   :  { %v631_v56 = vrot.slane %v630_v26, 4  ;;  %v615_v4 = vadd.f32 %v614_v52, %v587_v22  ;;  %v638_v61 = vadd.f32 %v637_v35, %v577_v30  ;;  %v593_v50 = vmul.f32 %v2161_v40, %v2161_v40 }
 0x181   :  { %v607_v55 = vrot.slane %v606_v14, 2  ;;  %v597_v2 = vmul.f32 %v2164_v46, %v2164_v46 }
 0x182   :  { %v632_v5 = vadd.f32 %v631_v56, %v630_v26  ;;  %v616_v12 = vadd.f32 %v615_v4, %v591_v3  ;;  %v639_v29 = vadd.f32 %v638_v61, %v581_v53 }
 0x183   :  { %v608_v11 = vadd.f32 %v607_v55, %v606_v14 }
 0x184   :  { %v633_v16 = vrot.slane %v632_v5, 2  ;;  %v617_v19 = vadd.f32 %v616_v12, %v595_v13  ;;  %v640_v37 = vadd.f32 %v639_v29, %v585_v21 }
 0x185   :  { %v609_v15 = vrot.slane %v608_v11, 1 }
 0x186   :  { %v618_v51 = vrot.slane %v617_v19, 4  ;;  %v634_v42 = vadd.f32 %v633_v16, %v632_v5  ;;  %v641_v54 = vadd.f32 %v640_v37, %v589_v20  ;;  %v1860_v20 = vmov 1966171168  }
 0x187   :  { %v610_v62 = vadd.f32 %v609_v15, %v608_v11  ;;  %v670_v37 = vunpack.c.l.s4 %v1860_v20 }
 0x188   :  { %v619_v6 = vadd.f32 %v618_v51, %v617_v19  ;;  %v642_v10 = vadd.f32 %v641_v54, %v593_v50  ;;  %v635_v14 = vrot.slane %v634_v42, 1  ;;  %v81_v19 = vlaneseq }
 0x189   :  { %v650_v22 = vmul.f32 0.015625, %v610_v62  ;;  %v671_v54 = vunpack.c.0.s8 %v670_v37 }
 0x18a   :  { %v620_v18 = vrot.slane %v619_v6, 2  ;;  %v643_v26 = vadd.f32 %v642_v10, %v597_v2  ;;  %v636_v55 = vadd.f32 %v635_v14, %v634_v42  ;;  %v82_v50 = vshrl.u32 %v81_v19, 7 }
 0x18b   :  { %v655_v3 = vadd.f32 1e-05, %v650_v22 }
 0x18c   :  { %v621_v52 = vadd.f32 %v620_v18, %v619_v6  ;;  %v644_v30 = vrot.slane %v643_v26, 4  ;;  %v652_v5 = vmul.f32 0.015625, %v636_v55  ;;  %v674_v6 = vsub.s32 %v671_v54, %v82_v50 }
 0x18d   :  { %1723 = vrsqrt.f32 %v655_v3  ;;  %v708_v3 = vsub.s32 3, %v82_v50 }
 0x18e   :  { %v622_v35 = vrot.slane %v621_v52, 1  ;;  %v645_v56 = vadd.f32 %v644_v30, %v643_v26  ;;  %v657_v21 = vadd.f32 1e-05, %v652_v5  ;;  %v654_v30 = vld [vmem:[#allocation7] ss:$2 sm:$0xf] }
 0x190   :  { %v623_v4 = vadd.f32 %v622_v35, %v621_v52  ;;  %v646_v53 = vrot.slane %v645_v56, 2  ;;  %v2190_v52 = vsub.s32 0, %v82_v50  ;;  %v2192_v35 = vsub.s32 1, %v82_v50 }
 0x192   :  { %v651_v61 = vmul.f32 0.015625, %v623_v4  ;;  %v647_v11 = vadd.f32 %v646_v53, %v645_v56  ;;  %v704_v56 = vsub.s32 2, %v82_v50  ;;  %v747_v4 = vld [vmem:[#allocation7 + $0x1] ss:$2 sm:$0xf] }
 0x193   :  { %v2197_v5 = vrot.slane %v747_v4, %v2192_v35 }
 0x194   :  { %v656_v13 = vadd.f32 1e-05, %v651_v61  ;;  %v648_v12 = vrot.slane %v647_v11, 1  ;;  %v2194_v61 = vrot.slane %v747_v4, %v708_v3 }
 0x196   :  { %1725 = vrsqrt.f32 %v656_v13  ;;  %v649_v29 = vadd.f32 %v648_v12, %v647_v11 }
 0x197   :  { %1727 = vrsqrt.f32 %v657_v21  ;;  %v1724_v51 = vpop.eup %1723 }
 0x198   :  { %v653_v15 = vmul.f32 0.015625, %v649_v29  ;;  %v2210_v29 = vrot.slane %v747_v4, %v2190_v52 }
 0x19a   :  { %v658_v16 = vadd.f32 1e-05, %v653_v15  ;;  %v2212_v15 = vrot.slane %v747_v4, %v704_v56 }
 0x19c   :  { %1729 = vrsqrt.f32 %v658_v16 }
 0x1a0   :  { %v1726_v42 = vpop.eup %1725 }
 0x1a1   :  { %v667_v62 = vcombine.low %v1724_v51, %v1726_v42  ;;  %v1728_v2 = vpop.eup %1727 }
 0x1a3   :  { %v675_v18 = vrot.slane %v667_v62, %v674_v6 }
 0x1a6   :  { %v1730_v10 = vpop.eup %1729 }
 0x1a7   :  { %v668_v14 = vcombine.low %v1728_v2, %v1730_v10 }
 0x1a9   :  { %v682_v26 = vrot.slane %v668_v14, %v674_v6 }
 0x1ab   :  { %v683_v22 = vcombine.low %v675_v18, %v682_v26 }
 0x1ad   :  { %v690_v55 = vrot.slane %v683_v22, %v674_v6 }
 0x1af   :  { %v692_v53 = vmul.f32 %v690_v55, %v654_v30 }
 0x1b1   :  { %v2200_v11 = vrot.slane %v692_v53, %v2190_v52  ;;  %v2203_v13 = vrot.slane %v692_v53, %v2192_v35  ;;  %v2205_v12 = vrot.slane %v692_v53, %v704_v56  ;;  %v2207_v21 = vrot.slane %v692_v53, %v708_v3 }
 0x1b3   :  { %v745_v16 = vmul.f32 %v2207_v21, %v2164_v46  ;;  %v715_v19 = vmul.f32 %v2203_v13, %v2103_v59  ;;  %v719_v20 = vmul.f32 %v2203_v13, %v2106_v60  ;;  %v717_v37 = vmul.f32 %v2207_v21, %v2143_v41 }
 0x1b4   :  { %v721_v51 = vmul.f32 %v2207_v21, %v2146_v49  ;;  %v714_v42 = vmul.f32 %v2200_v11, %v2037_v23  ;;  %v718_v50 = vmul.f32 %v2200_v11, %v2040_v24  ;;  %v716_v46 = vmul.f32 %v2205_v12, %v2065_v17 }
 0x1b5   :  { %v2231_v59 = vadd.f32 %v2194_v61, %v745_v16  ;;  %v770_v60 = vadd.f32 %v2197_v5, %v715_v19  ;;  %v774_v54 = vadd.f32 %v2197_v5, %v719_v20  ;;  %v772_v41 = vadd.f32 %v2194_v61, %v717_v37 }
 0x1b6   :  { %v776_v49 = vadd.f32 %v2194_v61, %v721_v51  ;;  %v769_v62 = vadd.f32 %v2210_v29, %v714_v42  ;;  %v773_v23 = vadd.f32 %v2210_v29, %v718_v50  ;;  %v720_v24 = vmul.f32 %v2205_v12, %v2068_v25 }
 0x1b7   :  { %v802_v6 = vmax.f32 %v770_v60, 0.0  ;;  %v806_v17 = vmax.f32 %v774_v54, 0.0  ;;  %v804_v2 = vmax.f32 %v772_v41, 0.0  ;;  %v771_v10 = vadd.f32 %v2212_v15, %v716_v46 }
 0x1b8   :  { %v808_v18 = vmax.f32 %v776_v49, 0.0  ;;  %v801_v14 = vmax.f32 %v769_v62, 0.0  ;;  %v805_v26 = vmax.f32 %v773_v23, 0.0  ;;  %v775_v22 = vadd.f32 %v2212_v15, %v720_v24 }
 0x1b9   :  { %v850_v30 = vpack.c.bf16 %v806_v17, %v802_v6  ;;  %v803_v55 = vmax.f32 %v771_v10, 0.0  ;;  %v723_v56 = vmul.f32 %v2203_v13, %v2109_v63  ;;  %v727_v3 = vmul.f32 %v2203_v13, %v2112_v0 }
 0x1ba   :  { %v852_v4 = vpack.c.bf16 %v808_v18, %v804_v2  ;;  %v849_v25 = vpack.c.bf16 %v805_v26, %v801_v14  ;;  %v807_v53 = vmax.f32 %v775_v22, 0.0  ;;  %v725_v16 = vmul.f32 %v2207_v21, %v2149_v57 }
 0x1bb   :  { %1281 = vmatprep.mubr.bf16.mxu1 %v850_v30  ;;  %v778_v19 = vadd.f32 %v2197_v5, %v723_v56  ;;  %v782_v20 = vadd.f32 %v2197_v5, %v727_v3  ;;  %v729_v37 = vmul.f32 %v2207_v21, %v2152_v1  ;;  %v722_v63 = vmul.f32 %v2200_v11, %v2043_v27 }
 0x1bc   :  { %1354 = vmatprep.mubr.bf16.mxu0 %v852_v4  ;;  %1282 = vmatmul.mubr.bf16.vlgmr.msra.gmra.mrb[16].mxu1 %v849_v25  ;;  %v851_v0 = vpack.c.bf16 %v807_v53, %v803_v55  ;;  %v780_v51 = vadd.f32 %v2194_v61, %v725_v16  ;;  %v726_v42 = vmul.f32 %v2200_v11, %v2046_v28  ;;  %v832_v57 = vmax.f32 %v2231_v59, 0.0 }
 0x1bd   :  { %v810_v50 = vmax.f32 %v778_v19, 0.0  ;;  %v814_v46 = vmax.f32 %v782_v20, 0.0  ;;  %v784_v60 = vadd.f32 %v2194_v61, %v729_v37  ;;  %v777_v54 = vadd.f32 %v2210_v29, %v722_v63 }
 0x1be   :  { %1355 = vmatmul.mubr.bf16.vlgmr.msra.gmra.mrb[16].mxu0 %v851_v0  ;;  %v812_v1 = vmax.f32 %v780_v51, 0.0  ;;  %v781_v27 = vadd.f32 %v2210_v29, %v726_v42  ;;  %v724_v41 = vmul.f32 %v2205_v12, %v2071_v36  ;;  %v728_v49 = vmul.f32 %v2205_v12, %v2074_v43 }
 0x1bf   :  { %v854_v62 = vpack.c.bf16 %v814_v46, %v810_v50  ;;  %v816_v28 = vmax.f32 %v784_v60, 0.0  ;;  %v809_v23 = vmax.f32 %v777_v54, 0.0  ;;  %v731_v24 = vmul.f32 %v2203_v13, %v2115_v7 }
 0x1c0   :  { %v813_v6 = vmax.f32 %v781_v27, 0.0  ;;  %v779_v17 = vadd.f32 %v2212_v15, %v724_v41  ;;  %v783_v2 = vadd.f32 %v2212_v15, %v728_v49  ;;  %v735_v10 = vmul.f32 %v2203_v13, %v2118_v8 }
 0x1c1   :  { %1291 = vmatprep.mubr.bf16.mxu1 %v854_v62  ;;  %v856_v18 = vpack.c.bf16 %v816_v28, %v812_v1  ;;  %v786_v36 = vadd.f32 %v2197_v5, %v731_v24  ;;  %v733_v43 = vmul.f32 %v2207_v21, %v2155_v9  ;;  %v737_v14 = vmul.f32 %v2207_v21, %v2158_v58 }
 0x1c2   :  { %v853_v26 = vpack.c.bf16 %v813_v6, %v809_v23  ;;  %v811_v7 = vmax.f32 %v779_v17, 0.0  ;;  %v815_v22 = vmax.f32 %v783_v2, 0.0  ;;  %v790_v30 = vadd.f32 %v2197_v5, %v735_v10 }
 0x1c3   :  { %1364 = vmatprep.mubr.bf16.mxu0 %v856_v18  ;;  %v818_v55 = vmax.f32 %v786_v36, 0.0  ;;  %v788_v56 = vadd.f32 %v2194_v61, %v733_v43  ;;  %v792_v8 = vadd.f32 %v2194_v61, %v737_v14  ;;  %v730_v3 = vmul.f32 %v2200_v11, %v2048_v31 }
 0x1c4   :  { %1292 = vmatmul.mubr.bf16.gmra.mrb[20].mxu1 %v853_v26  ;;  %v855_v4 = vpack.c.bf16 %v815_v22, %v811_v7  ;;  %v822_v9 = vmax.f32 %v790_v30, 0.0  ;;  %v734_v58 = vmul.f32 %v2200_v11, %v2050_v32  ;;  %v732_v25 = vmul.f32 %v2205_v12, %v2077_v44 }
 0x1c5   :  { %v820_v53 = vmax.f32 %v788_v56, 0.0  ;;  %v824_v16 = vmax.f32 %v792_v8, 0.0  ;;  %v785_v19 = vadd.f32 %v2210_v29, %v730_v3  ;;  %v736_v20 = vmul.f32 %v2205_v12, %v2080_v47 }
 0x1c6   :  { %1365 = vmatmul.mubr.bf16.gmra.mrb[20].mxu0 %v855_v4  ;;  %v858_v37 = vpack.c.bf16 %v822_v9, %v818_v55  ;;  %v789_v31 = vadd.f32 %v2210_v29, %v734_v58  ;;  %v787_v63 = vadd.f32 %v2212_v15, %v732_v25  ;;  %v739_v0 = vmul.f32 %v2203_v13, %v2121_v39 }
 0x1c7   :  { %v860_v32 = vpack.c.bf16 %v824_v16, %v820_v53  ;;  %v817_v51 = vmax.f32 %v785_v19, 0.0  ;;  %v791_v44 = vadd.f32 %v2212_v15, %v736_v20  ;;  %v743_v42 = vmul.f32 %v2203_v13, %v2124_v45 }
 0x1c8   :  { %1301 = vmatprep.mubr.bf16.mxu1 %v858_v37  ;;  %v821_v50 = vmax.f32 %v789_v31, 0.0  ;;  %v819_v46 = vmax.f32 %v787_v63, 0.0  ;;  %v794_v47 = vadd.f32 %v2197_v5, %v739_v0  ;;  %v741_v60 = vmul.f32 %v2207_v21, %v2161_v40 }
 0x1c9   :  { %1374 = vmatprep.mubr.bf16.mxu0 %v860_v32  ;;  %v823_v54 = vmax.f32 %v791_v44, 0.0  ;;  %v798_v1 = vadd.f32 %v2197_v5, %v743_v42  ;;  %v738_v39 = vmul.f32 %v2200_v11, %v2052_v33  ;;  %v742_v27 = vmul.f32 %v2200_v11, %v2054_v34 }
 0x1ca   :  { %v857_v41 = vpack.c.bf16 %v821_v50, %v817_v51  ;;  %v826_v45 = vmax.f32 %v794_v47, 0.0  ;;  %v796_v13 = vadd.f32 %v2194_v61, %v741_v60  ;;  %v740_v49 = vmul.f32 %v2205_v12, %v2082_v48 }
 0x1cb   :  { %v830_v62 = vmax.f32 %v798_v1, 0.0  ;;  %v793_v40 = vadd.f32 %v2210_v29, %v738_v39  ;;  %v797_v21 = vadd.f32 %v2210_v29, %v742_v27  ;;  %v859_v5 = vpack.c.bf16 %v823_v54, %v819_v46 }
 0x1cc   :  { %1302 = vmatmul.mubr.bf16.gmra.mrb[24].mxu1 %v857_v41  ;;  %v828_v28 = vmax.f32 %v796_v13, 0.0  ;;  %v744_v33 = vmul.f32 %v2205_v12, %v2084_v38  ;;  %v795_v34 = vadd.f32 %v2212_v15, %v740_v49  ;;  %v79_v38 = vld [vmem:[%s2359_s4] sm:$0x3]  ;;  %s1861_s4 = smov [#allocation10]  }
 0x1cd   :  { %v862_v11 = vpack.c.bf16 %v830_v62, %v826_v45  ;;  %v825_v23 = vmax.f32 %v793_v40, 0.0  ;;  %v829_v48 = vmax.f32 %v797_v21, 0.0  ;;  %v2319_v59 = vrot.slane %v79_v38, %v2190_v52  ;;  %s1432_s21 = sshll.u32 %s1861_s4, 4  ;;  %s1433_s21 = int_to_ptr.vmem [resolvable:$true] %s1432_s21 }
 0x1ce   :  { %1375 = vmatmul.mubr.bf16.gmra.mrb[24].mxu0 %v859_v5  ;;  %v864_v61 = vpack.c.bf16 %v832_v57, %v828_v28  ;;  %v799_v24 = vadd.f32 %v2212_v15, %v744_v33  ;;  %v827_v29 = vmax.f32 %v795_v34, 0.0  ;;  %v2322_v15 = vrot.slane %v79_v38, %v2192_v35  ;;  %s1819_s22 = scalar_lea.vmem %s1433_s21, 2048  ;;  %p1824_p5 = scmp.lt.s32.totalorder %s1433_s21, %s1433_s21 }
 0x1cf   :  { %1311 = vmatprep.mubr.bf16.mxu1 %v862_v11  ;;  %v861_v17 = vpack.c.bf16 %v829_v48, %v825_v23  ;;  %p1820_p4 = scmp.ne.s32.totalorder %s1433_s21, %s1819_s22  ;;  %p1825_p6 = scmp.lt.s32.totalorder %s1819_s22, %s1819_s22 }
 0x1d0   :  { %1384 = vmatprep.mubr.bf16.mxu0 %v864_v61  ;;  %v831_v6 = vmax.f32 %v799_v24, 0.0 }
 0x1d1   :  { %p1826_p7 = por %p1825_p6, %p1824_p5 }
 0x1d2   :  { %v863_v2 = vpack.c.bf16 %v831_v6, %v827_v29 }
 0x1d3   :  { %p1827_p8 = pnand %p1826_p7, %p1820_p4 }
 0x1d4   :  { %1312 = vmatmul.mubr.bf16.gmra.mrb[28].mxu1 %v861_v17 }
 0x1d6   :  { %1385 = vmatmul.mubr.bf16.gmra.mrb[28].mxu0 %v863_v2 }
 0x28f   :  { %v1283_v12 = vpop.f32.mrb[16].mxu1 }
 0x290   :  { %v1285_v57 = vpop.f32.mrb[17].mxu1 }
 0x291   :  { %v1356_v10 = vpop.f32.mrb[16].mxu0  ;;  %v1287_v18 = vpop.f32.mrb[18].mxu1 }
 0x292   :  { %v1357_v36 = vadd.f32 %v1356_v10, %v1283_v12  ;;  %v1358_v43 = vpop.f32.mrb[17].mxu0  ;;  %v1289_v14 = vpop.f32.mrb[19].mxu1 }
 0x293   :  { %v1359_v26 = vadd.f32 %v1358_v43, %v1285_v57  ;;  %v1360_v7 = vpop.f32.mrb[18].mxu0 }
 0x294   :  { %v1395_v22 = vadd.f32 %v1357_v36, %v2319_v59  ;;  %v1361_v30 = vadd.f32 %v1360_v7, %v1287_v18  ;;  %v1362_v55 = vpop.f32.mrb[19].mxu0 }
 0x295   :  { %v1396_v56 = vadd.f32 %v1359_v26, %v2322_v15  ;;  %v1363_v8 = vadd.f32 %v1362_v55, %v1289_v14 }
 0x296   :  { %1411 = vst [vmem:[#allocation10] sm:$0xff] %v1395_v22  ;;  %v1397_v52 = vadd.f32 %v1361_v30, %v2319_v59 }
 0x297   :  { %1412 = vst [vmem:[#allocation10 + $0x8] sm:$0xff] %v1396_v56  ;;  %v1398_v35 = vadd.f32 %v1363_v8, %v2322_v15  ;;  %v1293_v3 = vpop.f32.mrb[20].mxu1 }
 0x298   :  { %1413 = vst [vmem:[#allocation10 + $0x10] sm:$0xff] %v1397_v52  ;;  %v1295_v4 = vpop.f32.mrb[21].mxu1 }
 0x299   :  { %1414 = vst [vmem:[#allocation10 + $0x18] sm:$0xff] %v1398_v35  ;;  %v1366_v9 = vpop.f32.mrb[20].mxu0  ;;  %v1297_v58 = vpop.f32.mrb[22].mxu1 }
 0x29a   :  { %v1367_v25 = vadd.f32 %v1366_v9, %v1293_v3  ;;  %v1368_v53 = vpop.f32.mrb[21].mxu0  ;;  %v1299_v16 = vpop.f32.mrb[23].mxu1 }
 0x29b   :  { %v1369_v19 = vadd.f32 %v1368_v53, %v1295_v4  ;;  %v1370_v20 = vpop.f32.mrb[22].mxu0 }
 0x29c   :  { %v1399_v37 = vadd.f32 %v1367_v25, %v2319_v59  ;;  %v1371_v31 = vadd.f32 %v1370_v20, %v1297_v58  ;;  %v1372_v63 = vpop.f32.mrb[23].mxu0 }
 0x29d   :  { %v1400_v0 = vadd.f32 %v1369_v19, %v2322_v15  ;;  %v1373_v32 = vadd.f32 %v1372_v63, %v1299_v16 }
 0x29e   :  { %1415 = vst [vmem:[#allocation10 + $0x20] sm:$0xff] %v1399_v37  ;;  %v1401_v51 = vadd.f32 %v1371_v31, %v2319_v59 }
 0x29f   :  { %1416 = vst [vmem:[#allocation10 + $0x28] sm:$0xff] %v1400_v0  ;;  %v1402_v44 = vadd.f32 %v1373_v32, %v2322_v15  ;;  %v1303_v42 = vpop.f32.mrb[24].mxu1 }
 0x2a0   :  { %1417 = vst [vmem:[#allocation10 + $0x30] sm:$0xff] %v1401_v51  ;;  %v1305_v50 = vpop.f32.mrb[25].mxu1 }
 0x2a1   :  { %1418 = vst [vmem:[#allocation10 + $0x38] sm:$0xff] %v1402_v44  ;;  %v1376_v46 = vpop.f32.mrb[24].mxu0  ;;  %v1307_v47 = vpop.f32.mrb[26].mxu1 }
 0x2a2   :  { %v1377_v60 = vadd.f32 %v1376_v46, %v1303_v42  ;;  %v1378_v54 = vpop.f32.mrb[25].mxu0  ;;  %v1309_v1 = vpop.f32.mrb[27].mxu1 }
 0x2a3   :  { %v1379_v39 = vadd.f32 %v1378_v54, %v1305_v50  ;;  %v1380_v27 = vpop.f32.mrb[26].mxu0 }
 0x2a4   :  { %v1403_v41 = vadd.f32 %v1377_v60, %v2319_v59  ;;  %v1381_v45 = vadd.f32 %v1380_v27, %v1307_v47  ;;  %v1382_v13 = vpop.f32.mrb[27].mxu0 }
 0x2a5   :  { %v1404_v49 = vadd.f32 %v1379_v39, %v2322_v15  ;;  %v1383_v62 = vadd.f32 %v1382_v13, %v1309_v1 }
 0x2a6   :  { %1419 = vst [vmem:[#allocation10 + $0x40] sm:$0xff] %v1403_v41  ;;  %v1405_v40 = vadd.f32 %v1381_v45, %v2319_v59 }
 0x2a7   :  { %1420 = vst [vmem:[#allocation10 + $0x48] sm:$0xff] %v1404_v49  ;;  %v1406_v21 = vadd.f32 %v1383_v62, %v2322_v15  ;;  %v1313_v5 = vpop.f32.mrb[28].mxu1 }
 0x2a8   :  { %1421 = vst [vmem:[#allocation10 + $0x50] sm:$0xff] %v1405_v40  ;;  %v1315_v28 = vpop.f32.mrb[29].mxu1 }
 0x2a9   :  { %1422 = vst [vmem:[#allocation10 + $0x58] sm:$0xff] %v1406_v21  ;;  %v1386_v33 = vpop.f32.mrb[28].mxu0  ;;  %v1317_v34 = vpop.f32.mrb[30].mxu1 }
 0x2aa   :  { %v1387_v11 = vadd.f32 %v1386_v33, %v1313_v5  ;;  %v1388_v61 = vpop.f32.mrb[29].mxu0  ;;  %v1319_v23 = vpop.f32.mrb[31].mxu1 }
 0x2ab   :  { %v1389_v48 = vadd.f32 %v1388_v61, %v1315_v28  ;;  %v1390_v24 = vpop.f32.mrb[30].mxu0 }
 0x2ac   :  { %v1407_v29 = vadd.f32 %v1387_v11, %v2319_v59  ;;  %v1391_v6 = vadd.f32 %v1390_v24, %v1317_v34  ;;  %v1392_v17 = vpop.f32.mrb[31].mxu0 }
 0x2ad   :  { %v1408_v2 = vadd.f32 %v1389_v48, %v2322_v15  ;;  %v1393_v38 = vadd.f32 %v1392_v17, %v1319_v23 }
 0x2ae   :  { %1423 = vst [vmem:[#allocation10 + $0x60] sm:$0xff] %v1407_v29  ;;  %v1409_v12 = vadd.f32 %v1391_v6, %v2319_v59 }
 0x2af   :  { %1424 = vst [vmem:[#allocation10 + $0x68] sm:$0xff] %v1408_v2  ;;  %v1410_v57 = vadd.f32 %v1393_v38, %v2322_v15 }
 0x2b0   :  { %1425 = vst [vmem:[#allocation10 + $0x70] sm:$0xff] %v1409_v12 }
 0x2b1   :  { %1426 = vst [vmem:[#allocation10 + $0x78] sm:$0xff] %v1410_v57 }
 0x2b2   :  { %1830 = shalt.err (!%p1827_p8)
}
 0x2b3   :  { %s1831_s25 = scalar_lea.hbm %s2360_s5, 2048 }
 0x2b4   :  { %p1832_p9 = scmp.ne.s32.totalorder %s2360_s5, %s1831_s25  ;;  %p1835_p10 = scmp.lt.u32.totalorder %s1831_s25, %s2360_s5 }
 0x2b6   :  { %p1837_p11 = pnand %p1835_p10, %p1832_p9 }
 0x2b8   :  { %1840 = shalt.err (!%p1837_p11)
}
 0x2b9   :  { %1438 = dma.vmem_to_hbm [thread:$0]  %s1433_s21, 2048, %s2360_s5, [#allocation4], %s1850_s28, %s1850_s28, %s1851_s29  }
 0x2ba   :  { %1847 = dma.done.wait [#allocation4], 2048  }
 0x2bb   :  { %1848 = vsyncadd [#allocation4], 4294965248 }
 0x2bc   :  { %1442 = vsyncpa [#allocation3], 1 }
 0x2bd   :  { %1443 = vsyncpa [#allocation6], 1 }
 0x2be   :  { %1444 = vsyncpa [#allocation9], 1 }
 0x2bf   :  { %1445 = vsyncpa [#allocation4], 1 }

</bundles_post_ra>
